<compile_context>
chip_gen: v5e
topology: v5e:2x2
jax: 0.10.0
libtpu: 0.0.40
codegen_flags: <defaults>
</compile_context>

<pallas_src>
import functools
import numpy as np
import jax
import jax.numpy as jnp
from jax.experimental import pallas as pl
from jax.experimental.pallas import tpu as pltpu

# Fixed SRM filters (module default learnable=False) baked as compile-time constants.
_F1 = np.array([[0, 0, 0, 0, 0],
                [0, -1, 2, -1, 0],
                [0, 2, -4, 2, 0],
                [0, -1, 2, -1, 0],
                [0, 0, 0, 0, 0]], dtype=np.float32) / 4.0
_F2 = np.array([[-1, 2, -2, 2, -1],
                [2, -6, 8, -6, 2],
                [-2, 8, -12, 8, -2],
                [2, -6, 8, -6, 2],
                [-1, 2, -2, 2, -1]], dtype=np.float32) / 12.0
_F3 = np.array([[0, 0, 0, 0, 0],
                [0, 0, 0, 0, 0],
                [0, 1, -2, 1, 0],
                [0, 0, 0, 0, 0],
                [0, 0, 0, 0, 0]], dtype=np.float32) / 2.0
_SRM = np.stack([_F1, _F2, _F3])  # (3, 5, 5); group g uses filter g (np.repeat order)


def _srm_kernel(w_ref, b_ref, x_ref, o_ref, *, outc, H, Lout):
    """One batch block per grid step.

    w_ref: (outc, 3) SMEM  -- 1x1 weights with group replication + BN scale folded in
    b_ref: (outc,)   SMEM  -- folded BN bias
    x_ref: (1, 3, H+4, Lout+4) VMEM -- padded input; lane axis = bB*(W+4)+4
    o_ref: (1, outc, H, Lout)  VMEM -- lane axis = bB*(W+4); cols [b*(W+4), b*(W+4)+W)
                                       of image b are valid, the rest is sliced off
                                       by the wrapper.
    """
    def lane_shifts(c, offsets):
        # Column taps of the 5x5 conv as lane-shifted windows, sliced directly off
        # the ref: one lane relayout per distinct kj instead of one per nonzero tap.
        return [x_ref[0, c, :, kj:kj + Lout] for kj in offsets]

    # ---- channel 0 : F1/4 (nonzero taps only at ki,kj in {1,2,3}) ----------------
    h1, h2, h3 = lane_shifts(0, (1, 2, 3))
    e13 = h1 + h3                                    # symmetric-tap folding
    rowA = 0.5 * h2 - 0.25 * e13                     # filter rows ki = 1 and ki = 3
    rowB = 0.5 * e13 - h2                            # filter row  ki = 2
    d0 = rowA[1:1 + H, :] + rowB[2:2 + H, :] + rowA[3:3 + H, :]

    # ---- channel 1 : F2/12 (full 5x5) --------------------------------------------
    g0, g1, g2, g3, g4 = lane_shifts(1, (0, 1, 2, 3, 4))
    s04, s13 = g0 + g4, g1 + g3
    c12 = 1.0 / 12.0
    rowE = (2.0 * s13 - s04 - 2.0 * g2) * c12        # filter rows ki = 0 and ki = 4
    rowM = (2.0 * s04 - 6.0 * s13 + 8.0 * g2) * c12  # filter rows ki = 1 and ki = 3
    rowC = (8.0 * s13 - 2.0 * s04 - 12.0 * g2) * c12  # filter row ki = 2
    d1 = (rowE[0:H, :] + rowM[1:1 + H, :] + rowC[2:2 + H, :]
          + rowM[3:3 + H, :] + rowE[4:4 + H, :])

    # ---- channel 2 : F3/2 (single nonzero filter row ki = 2) ----------------------
    k1, k2, k3 = lane_shifts(2, (1, 2, 3))
    d2 = (0.5 * (k1 + k3) - k2)[2:2 + H, :]

    # Hardtanh(-3, 3) once per SRM group (the 3 replicas within a group are identical).
    d = (jnp.clip(d0, -3.0, 3.0), jnp.clip(d1, -3.0, 3.0), jnp.clip(d2, -3.0, 3.0))

    # 1x1 conv + BN + ReLU, with replication and BN scale pre-folded into w_ref.
    # outc=3 / K=3 stays on the VPU; MXU would be <3% utilized at this size.
    outs = [jnp.maximum(w_ref[o, 0] * d[0] + w_ref[o, 1] * d[1]
                        + w_ref[o, 2] * d[2] + b_ref[o], 0.0)
            for o in range(outc)]
    o_ref[0] = jnp.stack(outs, axis=0)               # single wide store per grid step


def srm_conv2d_filter(x, w1x1, bn_gamma, bn_beta, bn_mean, bn_var,
                      eps=1e-5, block_batch=None):
    """x: (B, inc=3, H, W) float32 NCHW. Returns (B, outc, H, W) float32."""
    B, C, H, W = x.shape
    assert C == 3, "kernel is specialized for the module default inc=3"
    outc = w1x1.shape[0]
    Wp = W + 4

    # ---- fold 3x group replication + BN (inference) into the 1x1 weights ----------
    scale = (bn_gamma / jnp.sqrt(bn_var + eps)).astype(jnp.float32)
    bias = (bn_beta.astype(jnp.float32) - bn_mean.astype(jnp.float32) * scale)
    w_eff = (w1x1.astype(jnp.float32).reshape(outc, C, 3).sum(-1) * scale[:, None])

    # ---- pick batch block: ~6 MiB double-buffered (fits v5e 16 MiB scoped VMEM and
    # v7x 64 MiB physical VMEM), and keep >=2 grid steps when B >= 2 so both v7x
    # TensorCores get work via the "parallel" batch-group axis. --------------------
    if block_batch is None:
        per_img = (C * (H + 4) * Wp + outc * H * Wp) * 4 * 2  # in+out, double-buffered
        block_batch = max(1, min((6 << 20) // per_img, B, -(-B // 2)))
    bB = int(block_batch)
    G = -(-B // bB)
    Bp = G * bB
    Lout = bB * Wp            # lane width of one block's output
    Lin = Lout + 4            # +4 tail zeros so every kj window stays in range

    # ---- wrapper-side layout plumbing (one fused XLA pass): NCHW ->
    # (G, C, H+4, bB*(W+4)+4) with all of a batch block's padded rows on the lane
    # axis; the 2-px halo is part of this same pass (no standalone padded x copy). --
    xg = x.astype(jnp.float32)
    if Bp != B:
        xg = jnp.pad(xg, ((0, Bp - B), (0, 0), (0, 0), (0, 0)))
    xg = xg.reshape(G, bB, C, H, W).transpose(0, 2, 3, 1, 4)          # (G,C,H,bB,W)
    xg = jnp.pad(xg, ((0, 0), (0, 0), (2, 2), (0, 0), (2, 2)))        # halo
    xg = xg.reshape(G, C, H + 4, Lout)
    xg = jnp.pad(xg, ((0, 0), (0, 0), (0, 0), (0, 4)))                # tail columns

    kernel = functools.partial(_srm_kernel, outc=outc, H=H, Lout=Lout)
    y = pl.pallas_call(
        kernel,
        out_shape=jax.ShapeDtypeStruct((G, outc, H, Lout), jnp.float32),
        grid=(G,),
        in_specs=[
            pl.BlockSpec(memory_space=pltpu.MemorySpace.SMEM),        # w_eff (outc,3)
            pl.BlockSpec(memory_space=pltpu.MemorySpace.SMEM),        # bias  (outc,)
            pl.BlockSpec((1, C, H + 4, Lin), lambda g: (g, 0, 0, 0)),
        ],
        out_specs=pl.BlockSpec((1, outc, H, Lout), lambda g: (g, 0, 0, 0)),
        compiler_params=pltpu.CompilerParams(dimension_semantics=("parallel",)),
    )(w_eff, bias, xg)

    # ---- undo layout plumbing: (G, outc, H, bB*(W+4)) -> (B, outc, H, W) ----------
    y = y.reshape(G, outc, H, bB, Wp)[..., :W]
    y = y.transpose(0, 3, 1, 2, 4).reshape(Bp, outc, H, W)
    return y[:B]


def _reference(x, w1x1, bn_gamma, bn_beta, bn_mean, bn_var, eps=1e-5):
    """Pure-JAX reference mirroring the PyTorch forward (inference-mode BN)."""
    kernel9 = jnp.asarray(np.repeat(_SRM[:, None, :, :], 3, axis=0))  # (9,1,5,5)
    out = jax.lax.conv_general_dilated(
        x, kernel9, window_strides=(1, 1), padding=((2, 2), (2, 2)),
        dimension_numbers=("NCHW", "OIHW", "NCHW"), feature_group_count=3)
    out = jnp.clip(out, -3.0, 3.0)
    out = jnp.einsum("ok,bkhw->bohw", w1x1, out)
    scale = bn_gamma / jnp.sqrt(bn_var + eps)
    bias = bn_beta - bn_mean * scale
    out = out * scale[None, :, None, None] + bias[None, :, None, None]
    return jnp.maximum(out, 0.0)


if __name__ == "__main__":
    key = jax.random.PRNGKey(0)
    kx, kw, kg, kb, km, kv = jax.random.split(key, 6)

    B, C, H, W = 2, 3, 16, 16
    outc = 3
    x = jax.random.normal(kx, (B, C, H, W), dtype=jnp.float32)

    # 1x1 conv weight: kaiming_normal_(a=1) -> std = 1/sqrt(fan_in), fan_in = 3*inc.
    fan_in = 3 * C
    w1x1 = (jax.random.normal(kw, (outc, 3 * C), dtype=jnp.float32)
            / jnp.sqrt(jnp.float32(fan_in)))

    # Non-trivial inference-mode BatchNorm2d stats to exercise the weight folding.
    gamma = 1.0 + 0.1 * jax.random.normal(kg, (outc,), dtype=jnp.float32)
    beta = 0.1 * jax.random.normal(kb, (outc,), dtype=jnp.float32)
    mean = 0.1 * jax.random.normal(km, (outc,), dtype=jnp.float32)
    var = jnp.abs(1.0 + 0.1 * jax.random.normal(kv, (outc,), dtype=jnp.float32))

    out = jax.jit(srm_conv2d_filter)(x, w1x1, gamma, beta, mean, var)
    out = jax.block_until_ready(out)

    ref = jax.block_until_ready(_reference(x, w1x1, gamma, beta, mean, var))
    np.testing.assert_allclose(np.asarray(out), np.asarray(ref), rtol=1e-4, atol=1e-4)

    print("KERNEL_OK")
</pallas_src>

<mosaic_0001>
module attributes {stable_mosaic.version = 11 : i64} {
  func.func @_srm_kernel(%arg0: i32, %arg1: memref<3x3xf32, #tpu.memory_space<smem>>, %arg2: memref<3xf32, #tpu.memory_space<smem>>, %arg3: memref<1x3x20x24xf32, #tpu.memory_space<vmem>>, %arg4: memref<1x3x16x20xf32, #tpu.memory_space<vmem>>) attributes {dimension_semantics = [#tpu.dimension_semantics<parallel>], iteration_bounds = array<i64: 2>, scalar_prefetch = 0 : i64, scratch_operands = 0 : i64, tpu.core_type = #tpu.core_type<tc>, window_params = [{transform_indices = @transform_0, window_bounds = array<i64: 3, 3>}, {transform_indices = @transform_1, window_bounds = array<i64: 3>}, {transform_indices = @transform_2, window_bounds = array<i64: 1, 3, 20, 24>}, {transform_indices = @transform_3, window_bounds = array<i64: 1, 3, 16, 20>}]} {
    %c0 = arith.constant 0 : index
    %c0_0 = arith.constant 0 : index
    %c0_1 = arith.constant 0 : index
    %c1 = arith.constant 1 : index
    %0 = vector.load %arg3[%c0, %c0_0, %c0_1, %c1] : memref<1x3x20x24xf32, #tpu.memory_space<vmem>>, vector<1x1x20x20xf32>
    %1 = vector.shape_cast %0 : vector<1x1x20x20xf32> to vector<20x20xf32>
    %c0_2 = arith.constant 0 : index
    %c0_3 = arith.constant 0 : index
    %c0_4 = arith.constant 0 : index
    %c2 = arith.constant 2 : index
    %2 = vector.load %arg3[%c0_2, %c0_3, %c0_4, %c2] : memref<1x3x20x24xf32, #tpu.memory_space<vmem>>, vector<1x1x20x20xf32>
    %3 = vector.shape_cast %2 : vector<1x1x20x20xf32> to vector<20x20xf32>
    %c0_5 = arith.constant 0 : index
    %c0_6 = arith.constant 0 : index
    %c0_7 = arith.constant 0 : index
    %c3 = arith.constant 3 : index
    %4 = vector.load %arg3[%c0_5, %c0_6, %c0_7, %c3] : memref<1x3x20x24xf32, #tpu.memory_space<vmem>>, vector<1x1x20x20xf32>
    %5 = vector.shape_cast %4 : vector<1x1x20x20xf32> to vector<20x20xf32>
    %6 = arith.addf %1, %5 : vector<20x20xf32>
    %cst = arith.constant 5.000000e-01 : f32
    %7 = vector.broadcast %cst : f32 to vector<20x20xf32>
    %8 = arith.mulf %7, %3 : vector<20x20xf32>
    %cst_8 = arith.constant 2.500000e-01 : f32
    %9 = vector.broadcast %cst_8 : f32 to vector<20x20xf32>
    %10 = arith.mulf %9, %6 : vector<20x20xf32>
    %11 = arith.subf %8, %10 : vector<20x20xf32>
    %cst_9 = arith.constant 5.000000e-01 : f32
    %12 = vector.broadcast %cst_9 : f32 to vector<20x20xf32>
    %13 = arith.mulf %12, %6 : vector<20x20xf32>
    %14 = arith.subf %13, %3 : vector<20x20xf32>
    %15 = vector.extract_strided_slice %11 {offsets = [1, 0], sizes = [16, 20], strides = [1, 1]} : vector<20x20xf32> to vector<16x20xf32>
    %16 = vector.extract_strided_slice %14 {offsets = [2, 0], sizes = [16, 20], strides = [1, 1]} : vector<20x20xf32> to vector<16x20xf32>
    %17 = arith.addf %15, %16 : vector<16x20xf32>
    %18 = vector.extract_strided_slice %11 {offsets = [3, 0], sizes = [16, 20], strides = [1, 1]} : vector<20x20xf32> to vector<16x20xf32>
    %19 = arith.addf %17, %18 : vector<16x20xf32>
    %c0_10 = arith.constant 0 : index
    %c1_11 = arith.constant 1 : index
    %c0_12 = arith.constant 0 : index
    %c0_13 = arith.constant 0 : index
    %20 = vector.load %arg3[%c0_10, %c1_11, %c0_12, %c0_13] : memref<1x3x20x24xf32, #tpu.memory_space<vmem>>, vector<1x1x20x20xf32>
    %21 = vector.shape_cast %20 : vector<1x1x20x20xf32> to vector<20x20xf32>
    %c0_14 = arith.constant 0 : index
    %c1_15 = arith.constant 1 : index
    %c0_16 = arith.constant 0 : index
    %c1_17 = arith.constant 1 : index
    %22 = vector.load %arg3[%c0_14, %c1_15, %c0_16, %c1_17] : memref<1x3x20x24xf32, #tpu.memory_space<vmem>>, vector<1x1x20x20xf32>
    %23 = vector.shape_cast %22 : vector<1x1x20x20xf32> to vector<20x20xf32>
    %c0_18 = arith.constant 0 : index
    %c1_19 = arith.constant 1 : index
    %c0_20 = arith.constant 0 : index
    %c2_21 = arith.constant 2 : index
    %24 = vector.load %arg3[%c0_18, %c1_19, %c0_20, %c2_21] : memref<1x3x20x24xf32, #tpu.memory_space<vmem>>, vector<1x1x20x20xf32>
    %25 = vector.shape_cast %24 : vector<1x1x20x20xf32> to vector<20x20xf32>
    %c0_22 = arith.constant 0 : index
    %c1_23 = arith.constant 1 : index
    %c0_24 = arith.constant 0 : index
    %c3_25 = arith.constant 3 : index
    %26 = vector.load %arg3[%c0_22, %c1_23, %c0_24, %c3_25] : memref<1x3x20x24xf32, #tpu.memory_space<vmem>>, vector<1x1x20x20xf32>
    %27 = vector.shape_cast %26 : vector<1x1x20x20xf32> to vector<20x20xf32>
    %c0_26 = arith.constant 0 : index
    %c1_27 = arith.constant 1 : index
    %c0_28 = arith.constant 0 : index
    %c4 = arith.constant 4 : index
    %28 = vector.load %arg3[%c0_26, %c1_27, %c0_28, %c4] : memref<1x3x20x24xf32, #tpu.memory_space<vmem>>, vector<1x1x20x20xf32>
    %29 = vector.shape_cast %28 : vector<1x1x20x20xf32> to vector<20x20xf32>
    %30 = arith.addf %21, %29 : vector<20x20xf32>
    %31 = arith.addf %23, %27 : vector<20x20xf32>
    %cst_29 = arith.constant 2.000000e+00 : f32
    %32 = vector.broadcast %cst_29 : f32 to vector<20x20xf32>
    %33 = arith.mulf %32, %31 : vector<20x20xf32>
    %34 = arith.subf %33, %30 : vector<20x20xf32>
    %cst_30 = arith.constant 2.000000e+00 : f32
    %35 = vector.broadcast %cst_30 : f32 to vector<20x20xf32>
    %36 = arith.mulf %35, %25 : vector<20x20xf32>
    %37 = arith.subf %34, %36 : vector<20x20xf32>
    %cst_31 = arith.constant 0.0833333358 : f32
    %38 = vector.broadcast %cst_31 : f32 to vector<20x20xf32>
    %39 = arith.mulf %37, %38 : vector<20x20xf32>
    %cst_32 = arith.constant 2.000000e+00 : f32
    %40 = vector.broadcast %cst_32 : f32 to vector<20x20xf32>
    %41 = arith.mulf %40, %30 : vector<20x20xf32>
    %cst_33 = arith.constant 6.000000e+00 : f32
    %42 = vector.broadcast %cst_33 : f32 to vector<20x20xf32>
    %43 = arith.mulf %42, %31 : vector<20x20xf32>
    %44 = arith.subf %41, %43 : vector<20x20xf32>
    %cst_34 = arith.constant 8.000000e+00 : f32
    %45 = vector.broadcast %cst_34 : f32 to vector<20x20xf32>
    %46 = arith.mulf %45, %25 : vector<20x20xf32>
    %47 = arith.addf %44, %46 : vector<20x20xf32>
    %cst_35 = arith.constant 0.0833333358 : f32
    %48 = vector.broadcast %cst_35 : f32 to vector<20x20xf32>
    %49 = arith.mulf %47, %48 : vector<20x20xf32>
    %cst_36 = arith.constant 8.000000e+00 : f32
    %50 = vector.broadcast %cst_36 : f32 to vector<20x20xf32>
    %51 = arith.mulf %50, %31 : vector<20x20xf32>
    %cst_37 = arith.constant 2.000000e+00 : f32
    %52 = vector.broadcast %cst_37 : f32 to vector<20x20xf32>
    %53 = arith.mulf %52, %30 : vector<20x20xf32>
    %54 = arith.subf %51, %53 : vector<20x20xf32>
    %cst_38 = arith.constant 1.200000e+01 : f32
    %55 = vector.broadcast %cst_38 : f32 to vector<20x20xf32>
    %56 = arith.mulf %55, %25 : vector<20x20xf32>
    %57 = arith.subf %54, %56 : vector<20x20xf32>
    %cst_39 = arith.constant 0.0833333358 : f32
    %58 = vector.broadcast %cst_39 : f32 to vector<20x20xf32>
    %59 = arith.mulf %57, %58 : vector<20x20xf32>
    %60 = vector.extract_strided_slice %39 {offsets = [0, 0], sizes = [16, 20], strides = [1, 1]} : vector<20x20xf32> to vector<16x20xf32>
    %61 = vector.extract_strided_slice %49 {offsets = [1, 0], sizes = [16, 20], strides = [1, 1]} : vector<20x20xf32> to vector<16x20xf32>
    %62 = arith.addf %60, %61 : vector<16x20xf32>
    %63 = vector.extract_strided_slice %59 {offsets = [2, 0], sizes = [16, 20], strides = [1, 1]} : vector<20x20xf32> to vector<16x20xf32>
    %64 = arith.addf %62, %63 : vector<16x20xf32>
    %65 = vector.extract_strided_slice %49 {offsets = [3, 0], sizes = [16, 20], strides = [1, 1]} : vector<20x20xf32> to vector<16x20xf32>
    %66 = arith.addf %64, %65 : vector<16x20xf32>
    %67 = vector.extract_strided_slice %39 {offsets = [4, 0], sizes = [16, 20], strides = [1, 1]} : vector<20x20xf32> to vector<16x20xf32>
    %68 = arith.addf %66, %67 : vector<16x20xf32>
    %c0_40 = arith.constant 0 : index
    %c2_41 = arith.constant 2 : index
    %c0_42 = arith.constant 0 : index
    %c1_43 = arith.constant 1 : index
    %69 = vector.load %arg3[%c0_40, %c2_41, %c0_42, %c1_43] : memref<1x3x20x24xf32, #tpu.memory_space<vmem>>, vector<1x1x20x20xf32>
    %70 = vector.shape_cast %69 : vector<1x1x20x20xf32> to vector<20x20xf32>
    %c0_44 = arith.constant 0 : index
    %c2_45 = arith.constant 2 : index
    %c0_46 = arith.constant 0 : index
    %c2_47 = arith.constant 2 : index
    %71 = vector.load %arg3[%c0_44, %c2_45, %c0_46, %c2_47] : memref<1x3x20x24xf32, #tpu.memory_space<vmem>>, vector<1x1x20x20xf32>
    %72 = vector.shape_cast %71 : vector<1x1x20x20xf32> to vector<20x20xf32>
    %c0_48 = arith.constant 0 : index
    %c2_49 = arith.constant 2 : index
    %c0_50 = arith.constant 0 : index
    %c3_51 = arith.constant 3 : index
    %73 = vector.load %arg3[%c0_48, %c2_49, %c0_50, %c3_51] : memref<1x3x20x24xf32, #tpu.memory_space<vmem>>, vector<1x1x20x20xf32>
    %74 = vector.shape_cast %73 : vector<1x1x20x20xf32> to vector<20x20xf32>
    %75 = arith.addf %70, %74 : vector<20x20xf32>
    %cst_52 = arith.constant 5.000000e-01 : f32
    %76 = vector.broadcast %cst_52 : f32 to vector<20x20xf32>
    %77 = arith.mulf %76, %75 : vector<20x20xf32>
    %78 = arith.subf %77, %72 : vector<20x20xf32>
    %79 = vector.extract_strided_slice %78 {offsets = [2, 0], sizes = [16, 20], strides = [1, 1]} : vector<20x20xf32> to vector<16x20xf32>
    %cst_53 = arith.constant -3.000000e+00 : f32
    %cst_54 = arith.constant 3.000000e+00 : f32
    %80 = vector.broadcast %cst_53 : f32 to vector<16x20xf32>
    %81 = arith.maximumf %80, %19 : vector<16x20xf32>
    %82 = vector.broadcast %cst_54 : f32 to vector<16x20xf32>
    %83 = arith.minimumf %82, %81 : vector<16x20xf32>
    %cst_55 = arith.constant -3.000000e+00 : f32
    %cst_56 = arith.constant 3.000000e+00 : f32
    %84 = vector.broadcast %cst_55 : f32 to vector<16x20xf32>
    %85 = arith.maximumf %84, %68 : vector<16x20xf32>
    %86 = vector.broadcast %cst_56 : f32 to vector<16x20xf32>
    %87 = arith.minimumf %86, %85 : vector<16x20xf32>
    %cst_57 = arith.constant -3.000000e+00 : f32
    %cst_58 = arith.constant 3.000000e+00 : f32
    %88 = vector.broadcast %cst_57 : f32 to vector<16x20xf32>
    %89 = arith.maximumf %88, %79 : vector<16x20xf32>
    %90 = vector.broadcast %cst_58 : f32 to vector<16x20xf32>
    %91 = arith.minimumf %90, %89 : vector<16x20xf32>
    %c0_59 = arith.constant 0 : index
    %c0_60 = arith.constant 0 : index
    %92 = memref.load %arg1[%c0_59, %c0_60] : memref<3x3xf32, #tpu.memory_space<smem>>
    %93 = vector.broadcast %92 : f32 to vector<16x20xf32>
    %94 = arith.mulf %93, %83 : vector<16x20xf32>
    %c0_61 = arith.constant 0 : index
    %c1_62 = arith.constant 1 : index
    %95 = memref.load %arg1[%c0_61, %c1_62] : memref<3x3xf32, #tpu.memory_space<smem>>
    %96 = vector.broadcast %95 : f32 to vector<16x20xf32>
    %97 = arith.mulf %96, %87 : vector<16x20xf32>
    %98 = arith.addf %94, %97 : vector<16x20xf32>
    %c0_63 = arith.constant 0 : index
    %c2_64 = arith.constant 2 : index
    %99 = memref.load %arg1[%c0_63, %c2_64] : memref<3x3xf32, #tpu.memory_space<smem>>
    %100 = vector.broadcast %99 : f32 to vector<16x20xf32>
    %101 = arith.mulf %100, %91 : vector<16x20xf32>
    %102 = arith.addf %98, %101 : vector<16x20xf32>
    %c0_65 = arith.constant 0 : index
    %103 = memref.load %arg2[%c0_65] : memref<3xf32, #tpu.memory_space<smem>>
    %104 = vector.broadcast %103 : f32 to vector<16x20xf32>
    %105 = arith.addf %102, %104 : vector<16x20xf32>
    %cst_66 = arith.constant 0.000000e+00 : f32
    %106 = vector.broadcast %cst_66 : f32 to vector<16x20xf32>
    %107 = arith.maximumf %105, %106 : vector<16x20xf32>
    %c1_67 = arith.constant 1 : index
    %c0_68 = arith.constant 0 : index
    %108 = memref.load %arg1[%c1_67, %c0_68] : memref<3x3xf32, #tpu.memory_space<smem>>
    %109 = vector.broadcast %108 : f32 to vector<16x20xf32>
    %110 = arith.mulf %109, %83 : vector<16x20xf32>
    %c1_69 = arith.constant 1 : index
    %c1_70 = arith.constant 1 : index
    %111 = memref.load %arg1[%c1_69, %c1_70] : memref<3x3xf32, #tpu.memory_space<smem>>
    %112 = vector.broadcast %111 : f32 to vector<16x20xf32>
    %113 = arith.mulf %112, %87 : vector<16x20xf32>
    %114 = arith.addf %110, %113 : vector<16x20xf32>
    %c1_71 = arith.constant 1 : index
    %c2_72 = arith.constant 2 : index
    %115 = memref.load %arg1[%c1_71, %c2_72] : memref<3x3xf32, #tpu.memory_space<smem>>
    %116 = vector.broadcast %115 : f32 to vector<16x20xf32>
    %117 = arith.mulf %116, %91 : vector<16x20xf32>
    %118 = arith.addf %114, %117 : vector<16x20xf32>
    %c1_73 = arith.constant 1 : index
    %119 = memref.load %arg2[%c1_73] : memref<3xf32, #tpu.memory_space<smem>>
    %120 = vector.broadcast %119 : f32 to vector<16x20xf32>
    %121 = arith.addf %118, %120 : vector<16x20xf32>
    %cst_74 = arith.constant 0.000000e+00 : f32
    %122 = vector.broadcast %cst_74 : f32 to vector<16x20xf32>
    %123 = arith.maximumf %121, %122 : vector<16x20xf32>
    %c2_75 = arith.constant 2 : index
    %c0_76 = arith.constant 0 : index
    %124 = memref.load %arg1[%c2_75, %c0_76] : memref<3x3xf32, #tpu.memory_space<smem>>
    %125 = vector.broadcast %124 : f32 to vector<16x20xf32>
    %126 = arith.mulf %125, %83 : vector<16x20xf32>
    %c2_77 = arith.constant 2 : index
    %c1_78 = arith.constant 1 : index
    %127 = memref.load %arg1[%c2_77, %c1_78] : memref<3x3xf32, #tpu.memory_space<smem>>
    %128 = vector.broadcast %127 : f32 to vector<16x20xf32>
    %129 = arith.mulf %128, %87 : vector<16x20xf32>
    %130 = arith.addf %126, %129 : vector<16x20xf32>
    %c2_79 = arith.constant 2 : index
    %c2_80 = arith.constant 2 : index
    %131 = memref.load %arg1[%c2_79, %c2_80] : memref<3x3xf32, #tpu.memory_space<smem>>
    %132 = vector.broadcast %131 : f32 to vector<16x20xf32>
    %133 = arith.mulf %132, %91 : vector<16x20xf32>
    %134 = arith.addf %130, %133 : vector<16x20xf32>
    %c2_81 = arith.constant 2 : index
    %135 = memref.load %arg2[%c2_81] : memref<3xf32, #tpu.memory_space<smem>>
    %136 = vector.broadcast %135 : f32 to vector<16x20xf32>
    %137 = arith.addf %134, %136 : vector<16x20xf32>
    %cst_82 = arith.constant 0.000000e+00 : f32
    %138 = vector.broadcast %cst_82 : f32 to vector<16x20xf32>
    %139 = arith.maximumf %137, %138 : vector<16x20xf32>
    %140 = vector.shape_cast %107 : vector<16x20xf32> to vector<1x16x20xf32>
    %141 = vector.shape_cast %123 : vector<16x20xf32> to vector<1x16x20xf32>
    %142 = vector.shape_cast %139 : vector<16x20xf32> to vector<1x16x20xf32>
    %143 = tpu.concatenate %140, %141, %142 in 0 : vector<1x16x20xf32>, vector<1x16x20xf32>, vector<1x16x20xf32> -> vector<3x16x20xf32>
    %c0_83 = arith.constant 0 : index
    %c0_84 = arith.constant 0 : index
    %c0_85 = arith.constant 0 : index
    %c0_86 = arith.constant 0 : index
    %144 = vector.load %arg4[%c0_83, %c0_84, %c0_85, %c0_86] : memref<1x3x16x20xf32, #tpu.memory_space<vmem>>, vector<1x3x16x20xf32>
    %145 = vector.shape_cast %144 : vector<1x3x16x20xf32> to vector<3x16x20xf32>
    %146 = vector.shape_cast %143 : vector<3x16x20xf32> to vector<1x3x16x20xf32>
    tpu.vector_store %arg4[%c0_83, %c0_84, %c0_85, %c0_86], %146 {strides = array<i32>} : memref<1x3x16x20xf32, #tpu.memory_space<vmem>>, vector<1x3x16x20xf32>,
    return
  }
  func.func @transform_0(%arg0: i32) -> (i32, i32) {
    %c0_i32 = arith.constant 0 : i32
    %c0_i32_0 = arith.constant 0 : i32
    %c0_i32_1 = arith.constant 0 : i32
    return %c0_i32, %c0_i32_0 : i32, i32
  }
  func.func @transform_1(%arg0: i32) -> i32 {
    %c0_i32 = arith.constant 0 : i32
    %c0_i32_0 = arith.constant 0 : i32
    return %c0_i32 : i32
  }
  func.func @transform_2(%arg0: i32) -> (i32, i32, i32, i32) {
    %c0_i32 = arith.constant 0 : i32
    %c0_i32_0 = arith.constant 0 : i32
    %c0_i32_1 = arith.constant 0 : i32
    %c0_i32_2 = arith.constant 0 : i32
    return %arg0, %c0_i32, %c0_i32_0, %c0_i32_1 : i32, i32, i32, i32
  }
  func.func @transform_3(%arg0: i32) -> (i32, i32, i32, i32) {
    %c0_i32 = arith.constant 0 : i32
    %c0_i32_0 = arith.constant 0 : i32
    %c0_i32_1 = arith.constant 0 : i32
    %c0_i32_2 = arith.constant 0 : i32
    return %arg0, %c0_i32, %c0_i32_0, %c0_i32_1 : i32, i32, i32, i32
  }
}

</mosaic_0001>

<bundles_post_ra>
// kernel: srm_conv2d_filter.1
= control target key start
LH: loop header
LB: loop body
LE: loop exit
PB: predicated region body
PF: predicated region fallthrough
CT: control target
= control target key end

     0   :  { %8 = vsyncpa [#allocation3], 0  ;;  %s1259_s0 = inlined_call_operand.vmem [shape: f32[3,3], index: 0, kind: input, shape index: {}]   ;;  %s1260_s1 = inlined_call_operand.vmem [shape: f32[3], index: 1, kind: input, shape index: {}]   ;;  %s1261_s2 = inlined_call_operand.vmem [shape: f32[2,3,20,24], index: 2, kind: input, shape index: {}]   ;;  %s1262_s3 = inlined_call_operand.vmem [shape: f32[2,3,16,20], index: 3, kind: output, shape index: {}]  }
   0x1   :  { %9 = vsyncpa [#allocation5], 0  ;;  %s991_s12 = smov 0  }
   0x2 LB: > { %s847_s13 = sadd.s32 4294967295, %s963_s12   ;;  %p849_p0 = scmp.ge.s32.totalorder %s963_s12, 1  ;;  %s963_s12 = sphi %s991_s12, %s15_s12  }
   0x3   : > { %p114_p1 = scmp.lt.s32.totalorder %s963_s12, 3  ;;  %s126_s16 = sshll.u32 %s1259_s0, 4  ;;  %s127_s16 = int_to_ptr.vmem [resolvable:$true] %s126_s16 }
   0x4   : > { %p901_p3 = scmp.eq.s32.totalorder %s847_s13, 0  ;;  %s136_s19 = sshll.u32 %s1260_s1, 4  ;;  %s137_s19 = int_to_ptr.vmem [resolvable:$true] %s136_s19 }
   0x5   : > { %p115_p2 = pnand %p849_p0, %p114_p1  ;;  %s965_s20 = smov [#allocation2]  }
   0x6   : > { %s966_s21 = smov [#allocation4]  }
   0x7   : > { %p894_p4 = pneg %p115_p2 }
   0x8   : > { %157 = sbr.rel (%p115_p2) target bundleno = 715 (0x2cb), region = 32 }
   0x9   : > { %p895_p5 = pnand %p901_p3, %p894_p4 }
   0xb   : > { %897 = dma.vmem_to_smem (!%p895_p5), %s127_s16, 64, %s965_s20, [#allocation3]  }
   0xc   : > { %900 = dma.vmem_to_smem (!%p895_p5), %s137_s19, 16, %s966_s21, [#allocation5]  }
   0xd   : > { %954 = dma.done.wait (%p901_p3), [#allocation3], 64  }
   0xe   : > { %956 = vsyncadd (%p901_p3), [#allocation3], 4294967232 }
   0xf   : > { %958 = dma.done.wait (%p901_p3), [#allocation5], 16  }
  0x10   : > { %960 = vsyncadd (%p901_p3), [#allocation5], 4294967280 }
  0x11   : > { %169 = sfence }
  0x12   : > { %p188_p6 = scmp.lt.s32.totalorder %s847_s13, 1  ;;  %s967_s26 = smov 126   ;;  %vm255_vm0 = vcmask 1046528   ;;  %vm276_vm1 = vcmask 1045504   ;;  %vm467_vm2 = vcmask 1044480   ;;  %vm484_vm3 = vcmask 1043456  }
  0x13   : > { %s968_s27 = smov 124   ;;  %s969_s28 = smov 127   ;;  %vm555_vm4 = vcmask 1040384   ;;  %vm760_vm5 = vcmask 162816   ;;  %vm758_vm6 = vcmask 162817   ;;  %vm762_vm7 = vcmask 155648  }
  0x14   : > { %s1264_s13 = smov (!%p188_p6, %s847_s13), 1  ;;  %s970_s29 = smov 1  }
  0x15   : > { %s884_s22 = smul.u32 72, %s1264_s13  ;;  %s873_s30 = sld [smem:[#allocation2 + $0x2]] }
  0x16   : > { %s1191_s4 = sld [smem:[#allocation2 + $0x1]]  ;;  %s885_s17 = smul.u32 48, %s1264_s13 }
  0x17   : > { %s1016_s25 = scalar_lea.vmem %s1261_s2, %s884_s22  ;;  %s1193_s5 = sld [smem:[#allocation2 + $0x81]] }
  0x18   : > { %v1019_v0 = vld [vmem:[%s1016_s25 + $0x28] sm:$0xf]  ;;  %v858_v1 = vld [vmem:[%s1016_s25 + $0x18] sm:$0xff]  ;;  %v1031_v3 = vld [vmem:[%s1016_s25 + $0x20] sm:$0xff]  ;;  %s1196_s6 = sld [smem:[#allocation2 + $0x101]]  ;;  %s197_s20 = scalar_lea.vmem %s1262_s3, %s885_s17 }
  0x19   : > { %311 = vrot.lane.b32.xlu1 %v1019_v0, %s967_s26  ;;  %307 = vrot.lane.b32.xlu0 %v858_v1, %s967_s26  ;;  %v1026_v2 = vld [vmem:[%s1016_s25 + $0x8] sm:$0xff]  ;;  %v1034_v4 = vld [vmem:[%s1016_s25] sm:$0xff]  ;;  %v379_v6 = vmul.f32 8.0, %v858_v1  ;;  %v380_v7 = vmul.f32 8.0, %v1031_v3  ;;  %v381_v8 = vmul.f32 8.0, %v1019_v0  ;;  %v418_v9 = vmul.f32 12.0, %v858_v1 }
  0x1a   : > { %206 = vrot.lane.b32.xlu2 %v1026_v2, %s967_s26  ;;  %v1037_v5 = vld [vmem:[%s1016_s25 + $0x10] sm:$0xf]  ;;  %v419_v11 = vmul.f32 12.0, %v1031_v3  ;;  %v337_v21 = vmul.f32 2.0, %v858_v1  ;;  %v339_v27 = vmul.f32 2.0, %v1019_v0  ;;  %v1079_v33 = vld [vmem:[%s1016_s25 + $0x38] sm:$0xff] }
  0x1b   : > { %v338_v43 = vmul.f32 2.0, %v1031_v3  ;;  %v420_v44 = vmul.f32 12.0, %v1019_v0  ;;  %v1105_v48 = vld [vmem:[%s1016_s25 + $0x40] sm:$0xf]  ;;  %v1111_v53 = vld [vmem:[%s1016_s25 + $0x30] sm:$0xff]  ;;  %s876_s7 = sld [smem:[#allocation2 + $0x82]] }
  0x1c   : > { %s880_s8 = sld [smem:[#allocation2 + $0x102]] }
  0x1d   : > { %s544_s9 = sld [smem:[#allocation2]] }
  0x1e   : > { %s596_s10 = sld [smem:[#allocation4]] }
  0x1f   : > { %s874_s11 = sld [smem:[#allocation2 + $0x80]] }
  0x20   : > { %s877_s14 = sld [smem:[#allocation4 + $0x1]] }
  0x21   : > { %309 = vrot.lane.b32.xlu0 %v1031_v3, %s967_s26  ;;  %204 = vrot.lane.b32.xlu1 %v1034_v4, %s967_s26  ;;  %s878_s15 = sld [smem:[#allocation2 + $0x100]] }
  0x22   : > { %208 = vrot.lane.b32.xlu2 %v1037_v5, %s967_s26  ;;  %s881_s16 = sld [smem:[#allocation4 + $0x2]] }
  0x29   : > { %295 = vrot.lane.b32.xlu0 %v858_v1, %s968_s27  ;;  %297 = vrot.lane.b32.xlu1 %v1031_v3, %s968_s27 }
  0x2a   : > { %299 = vrot.lane.b32.xlu2 %v1019_v0, %s968_s27 }
  0x31   : > { %385 = vrot.lane.b32.xlu0 %v379_v6, %s967_s26  ;;  %387 = vrot.lane.b32.xlu1 %v380_v7, %s967_s26 }
  0x32   : > { %389 = vrot.lane.b32.xlu2 %v381_v8, %s967_s26  ;;  %v218_v8 = vmul.f32 0.5, %v1037_v5 }
  0x39   : > { %240 = vrot.lane.b32.xlu0 %v1034_v4, %s969_s28  ;;  %242 = vrot.lane.b32.xlu1 %v1026_v2, %s969_s28 }
  0x3a   : > { %244 = vrot.lane.b32.xlu2 %v1037_v5, %s969_s28 }
  0x41   : > { %426 = vrot.lane.b32.xlu0 %v419_v11, %s969_s28 }
  0x42   : > { %424 = vrot.lane.b32.xlu2 %v418_v9, %s969_s28 }
  0x74   : > { %v207_v10 = vpop.permute.xlu2 %206 }
  0x75   : > { %v214_v28 = vadd.f32 %v207_v10, %v1026_v2 }
  0x77   : > { %v220_v30 = vmul.f32 0.25, %v214_v28  ;;  %v238_v52 = vmul.f32 0.5, %v214_v28 }
  0x7c   : > { %v209_v12 = vpop.permute.xlu2 %208 }
  0x7d   : > { %v215_v13 = vadd.f32 %v209_v12, %v1037_v5 }
  0x7f   : > { %v221_v14 = vmul.f32 0.25, %v215_v13  ;;  %v239_v40 = vmul.f32 0.5, %v215_v13  ;;  %v216_v13 = vmul.f32 0.5, %v1034_v4 }
  0x81   : > { %229 = vrot.lane.b32.xlu2 %v221_v14, %s970_s29  ;;  %v217_v14 = vmul.f32 0.5, %v1026_v2 }
  0x84   : > { %v300_v22 = vpop.permute.xlu2 %299 }
  0x85   : > { %v306_v36 = vadd.f32 %v1019_v0, %v300_v22 }
  0x87   : > { %v1091_v37 = vmul.f32 2.0, %v306_v36 }
  0x8b   : > { %v312_v15 = vpop.permute.xlu1 %311  ;;  %v308_v16 = vpop.permute.xlu0 %307 }
  0x8c   : > { %v1064_v17 = vadd.f32 %v1019_v0, %v312_v15  ;;  %v1076_v32 = vpop.permute.xlu2 %389  ;;  %v1083_v34 = vadd.f32 %v858_v1, %v308_v16 }
  0x8e   : > { %v363_v18 = vmul.f32 6.0, %v1064_v17  ;;  %v361_v38 = vmul.f32 6.0, %v1083_v34 }
  0x90   : > { %371 = vrot.lane.b32.xlu2 %v363_v18, %s969_s28 }
  0x93   : > { %v310_v19 = vpop.permute.xlu0 %309  ;;  %v205_v20 = vpop.permute.xlu1 %204 }
  0x94   : > { %v213_v29 = vadd.f32 %v205_v20, %v1034_v4  ;;  %v1086_v35 = vadd.f32 %v1031_v3, %v310_v19  ;;  %v245_v41 = vpop.permute.xlu2 %244 }
  0x95   : > { %v251_v42 = vsub.f32 %v239_v40, %v245_v41 }
  0x96   : > { %v219_v31 = vmul.f32 0.25, %v213_v29  ;;  %v362_v39 = vmul.f32 6.0, %v1086_v35  ;;  %v237_v51 = vmul.f32 0.5, %v213_v29 }
  0x97   : > { %v259_v45 = vrot.slane %v251_v42, 1 }
  0x98   : > { %343 = vrot.lane.b32.xlu2 %v337_v21, %s969_s28 }
  0x9b   : > { %v296_v23 = vpop.permute.xlu0 %295  ;;  %v298_v24 = vpop.permute.xlu1 %297 }
  0x9c   : > { %v304_v25 = vadd.f32 %v858_v1, %v296_v23  ;;  %v305_v26 = vadd.f32 %v1031_v3, %v298_v24  ;;  %v1121_v62 = vpop.permute.xlu2 %424  ;;  %v319_v1 = vmul.f32 2.0, %v1083_v34  ;;  %v320_v3 = vmul.f32 2.0, %v1086_v35 }
  0x9e   : > { %325 = vrot.lane.b32.xlu0 %v304_v25, %s970_s29  ;;  %327 = vrot.lane.b32.xlu1 %v305_v26, %s970_s29  ;;  %v358_v54 = vmul.f32 2.0, %v304_v25  ;;  %v359_v59 = vmul.f32 2.0, %v305_v26 }
  0xa0   : > { %347 = vrot.lane.b32.xlu2 %v339_v27, %s969_s28 }
  0xa3   : > { %v386_v46 = vpop.permute.xlu0 %385  ;;  %v388_v47 = vpop.permute.xlu1 %387 }
  0xa6   : > { %225 = vrot.lane.b32.xlu0 %v219_v31, %s970_s29  ;;  %227 = vrot.lane.b32.xlu1 %v220_v30, %s970_s29 }
  0xa8   : > { %503 = vrot.lane.b32.xlu2 %v1079_v33, %s967_s26 }
  0xab   : > { %v241_v49 = vpop.permute.xlu0 %240  ;;  %v243_v50 = vpop.permute.xlu1 %242 }
  0xac   : > { %v249_v55 = vsub.f32 %v237_v51, %v241_v49  ;;  %v250_v56 = vsub.f32 %v238_v52, %v243_v50 }
  0xae   : > { %367 = vrot.lane.b32.xlu0 %v361_v38, %s969_s28  ;;  %369 = vrot.lane.b32.xlu1 %v362_v39, %s969_s28  ;;  %v256_v57 = vrot.slane %v249_v55, 1  ;;  %v257_v58 = vrot.slane %v250_v56, 1 }
  0xb0   : > { %410 = vrot.lane.b32.xlu2 %v1091_v37, %s970_s29  ;;  %v258_v60 = vsel %vm255_vm0, %v256_v57, %v257_v58  ;;  %v260_v61 = vsel %vm255_vm0, %v257_v58, %v259_v45  ;;  %v321_v57 = vmul.f32 2.0, %v1064_v17 }
  0xb3   : > { %v1123_v63 = vpop.permute.xlu0 %426 }
  0xb6   : > { %345 = vrot.lane.b32.xlu0 %v338_v43, %s969_s28  ;;  %428 = vrot.lane.b32.xlu1 %v420_v44, %s969_s28 }
  0xb8   : > { %265 = vrot.lane.b32.xlu2 %v259_v45, %s970_s29 }
  0xbe   : > { %505 = vrot.lane.b32.xlu0 %v1105_v48, %s967_s26  ;;  %329 = vrot.lane.b32.xlu1 %v306_v36, %s970_s29 }
  0xc6   : > { %406 = vrot.lane.b32.xlu0 %v358_v54, %s970_s29  ;;  %501 = vrot.lane.b32.xlu1 %v1111_v53, %s967_s26 }
  0xce   : > { %408 = vrot.lane.b32.xlu1 %v359_v59, %s970_s29  ;;  %261 = vrot.lane.b32.xlu0 %v258_v60, %s970_s29 }
  0xd6   : > { %263 = vrot.lane.b32.xlu1 %v260_v61, %s970_s29 }
  0xdb   : > { %v230_v0 = vpop.permute.xlu2 %229 }
  0xdc   : > { %v1128_v12 = vsub.f32 %v218_v8, %v230_v0 }
  0xde   : > { %v280_v18 = vrot.slane %v1128_v12, 2 }
  0xea   : > { %v372_v9 = vpop.permute.xlu2 %371 }
  0xeb   : > { %v378_v21 = vsub.f32 %v1091_v37, %v372_v9 }
  0xed   : > { %v396_v24 = vadd.f32 %v1076_v32, %v378_v21 }
  0xef   : > { %v399_v29 = vmul.f32 0.083333336, %v396_v24 }
  0xf1   : > { %v445_v40 = vrot.slane %v399_v29, 1 }
  0xf2   : > { %v344_v5 = vpop.permute.xlu2 %343 }
  0xfa   : > { %v348_v36 = vpop.permute.xlu2 %347 }
 0x102   : > { %v504_v56 = vpop.permute.xlu2 %503 }
 0x110   : > { %v326_v6 = vpop.permute.xlu0 %325  ;;  %v328_v7 = vpop.permute.xlu1 %327 }
 0x111   : > { %v334_v10 = vsub.f32 %v319_v1, %v326_v6  ;;  %v335_v11 = vsub.f32 %v320_v3, %v328_v7 }
 0x113   : > { %v352_v37 = vsub.f32 %v334_v10, %v344_v5  ;;  %v400_v10 = vmul.f32 8.0, %v1083_v34 }
 0x115   : > { %v1151_v52 = vmul.f32 0.083333336, %v352_v37 }
 0x117   : > { %v485_v55 = vrot.slane %v1151_v52, 4 }
 0x118   : > { %v226_v15 = vpop.permute.xlu0 %225  ;;  %v228_v16 = vpop.permute.xlu1 %227 }
 0x119   : > { %v1133_v19 = vsub.f32 %v216_v13, %v226_v15  ;;  %v1135_v20 = vsub.f32 %v217_v14, %v228_v16  ;;  %v411_v13 = vpop.permute.xlu2 %410  ;;  %v402_v14 = vmul.f32 8.0, %v1064_v17 }
 0x11b   : > { %v277_v22 = vrot.slane %v1133_v19, 2  ;;  %v278_v23 = vrot.slane %v1135_v20, 2  ;;  %v417_v16 = vsub.f32 %v402_v14, %v411_v13  ;;  %v631_v14 = vstv %s876_s7 }
 0x11d   : > { %v1141_v4 = vsel %vm276_vm1, %v277_v22, %v278_v23  ;;  %v1146_v2 = vsel %vm276_vm1, %v278_v23, %v280_v18  ;;  %v401_v22 = vmul.f32 8.0, %v1086_v35 }
 0x120   : > { %v368_v25 = vpop.permute.xlu0 %367  ;;  %v370_v26 = vpop.permute.xlu1 %369 }
 0x121   : > { %v376_v27 = vsub.f32 %v358_v54, %v368_v25  ;;  %v377_v28 = vsub.f32 %v359_v59, %v370_v26  ;;  %v471_v59 = vrot.slane %v399_v29, 3 }
 0x123   : > { %v394_v30 = vadd.f32 %v386_v46, %v376_v27  ;;  %v395_v31 = vadd.f32 %v388_v47, %v377_v28 }
 0x125   : > { %v397_v38 = vmul.f32 0.083333336, %v394_v30  ;;  %v398_v39 = vmul.f32 0.083333336, %v395_v31 }
 0x127   : > { %v442_v41 = vrot.slane %v397_v38, 1  ;;  %v468_v42 = vrot.slane %v397_v38, 3  ;;  %v443_v43 = vrot.slane %v398_v39, 1  ;;  %v469_v44 = vrot.slane %v398_v39, 3  ;;  %v1188_v39 = vpop.permute.xlu2 %265 }
 0x128   : > { %v346_v45 = vpop.permute.xlu0 %345  ;;  %v429_v49 = vpop.permute.xlu1 %428 }
 0x129   : > { %v353_v32 = vsub.f32 %v335_v11, %v346_v45  ;;  %v470_v50 = vsel %vm467_vm2, %v468_v42, %v469_v44  ;;  %v446_v51 = vsel %vm255_vm0, %v443_v43, %v445_v40  ;;  %v444_v46 = vsel %vm255_vm0, %v442_v41, %v443_v43 }
 0x12a   : > { %473 = vrot.lane.b32.xlu2 %v470_v50, %s970_s29  ;;  %449 = vrot.lane.b32.xlu1 %v446_v51, %s970_s29  ;;  %v472_v1 = vsel %vm467_vm2, %v469_v44, %v471_v59  ;;  %v435_v21 = vsub.f32 %v417_v16, %v429_v49  ;;  %v511_v40 = vadd.f32 %v1079_v33, %v504_v56 }
 0x12b   : > { %v356_v47 = vmul.f32 0.083333336, %v353_v32  ;;  %447 = vrot.lane.b32.xlu0 %v444_v46, %s970_s29  ;;  %v572_v46 = vstv %s873_s30 }
 0x12c   : > { %v438_v26 = vmul.f32 0.083333336, %v435_v21 }
 0x12d   : > { %v486_v54 = vrot.slane %v356_v47, 4 }
 0x12e   : > { %v461_v30 = vrot.slane %v438_v26, 2 }
 0x12f   : > { %v1160_v58 = vsel %vm484_vm3, %v485_v55, %v486_v54 }
 0x130   : > { %v1162_v60 = vpop.permute.xlu0 %505  ;;  %v330_v61 = vpop.permute.xlu1 %329 }
 0x131   : > { %v336_v0 = vsub.f32 %v321_v57, %v330_v61  ;;  %v610_v61 = vstv %s1193_s5 }
 0x132   : > { %516 = vrot.lane.b32.xlu1 %v1111_v53, %s969_s28  ;;  %518 = vrot.lane.b32.xlu2 %v1079_v33, %s969_s28 }
 0x133   : > { %v354_v3 = vsub.f32 %v336_v0, %v348_v36  ;;  %475 = vrot.lane.b32.xlu0 %v472_v1, %s970_s29  ;;  %v669_v0 = vstv %s1196_s6 }
 0x135   : > { %v357_v6 = vmul.f32 0.083333336, %v354_v3 }
 0x137   : > { %v488_v7 = vrot.slane %v357_v6, 4 }
 0x138   : > { %v407_v8 = vpop.permute.xlu0 %406  ;;  %v502_v9 = vpop.permute.xlu1 %501 }
 0x139   : > { %v489_v11 = vsel %vm484_vm3, %v486_v54, %v488_v7  ;;  %v415_v15 = vsub.f32 %v400_v10, %v407_v8 }
 0x13b   : > { %520 = vrot.lane.b32.xlu0 %v1105_v48, %s969_s28  ;;  %v433_v5 = vsub.f32 %v415_v15, %v1121_v62 }
 0x13d   : > { %v436_v27 = vmul.f32 0.083333336, %v433_v5 }
 0x13f   : > { %v458_v31 = vrot.slane %v436_v27, 2 }
 0x140   : > { %v262_v23 = vpop.permute.xlu0 %261  ;;  %v409_v24 = vpop.permute.xlu1 %408 }
 0x141   : > { %v270_v25 = vadd.f32 %v262_v23, %v1133_v19  ;;  %v416_v34 = vsub.f32 %v401_v22, %v409_v24 }
 0x143   : > { %v1179_v28 = vadd.f32 %v1141_v4, %v270_v25  ;;  %v434_v17 = vsub.f32 %v416_v34, %v1123_v63  ;;  %v514_v63 = vmul.f32 0.5, %v511_v40 }
 0x145   : > { %v437_v29 = vmul.f32 0.083333336, %v434_v17 }
 0x147   : > { %v459_v36 = vrot.slane %v437_v29, 2 }
 0x148   : > { %v264_v37 = vpop.permute.xlu1 %263 }
 0x149   : > { %v271_v62 = vadd.f32 %v264_v37, %v1135_v20  ;;  %v460_v35 = vsel %vm276_vm1, %v458_v31, %v459_v36  ;;  %v462_v38 = vsel %vm276_vm1, %v459_v36, %v461_v30 }
 0x14b   : > { %v1186_v19 = vadd.f32 %v1146_v2, %v271_v62  ;;  %v510_v2 = vadd.f32 %v1111_v53, %v502_v9  ;;  %v550_v53 = vstv %s1191_s4 }
 0x14d   : > { %v513_v50 = vmul.f32 0.5, %v510_v2 }
 0x184   : > { %v474_v4 = vpop.permute.xlu2 %473 }
 0x18c   : > { %v519_v41 = vpop.permute.xlu2 %518 }
 0x18d   : > { %v526_v45 = vsub.f32 %v514_v63, %v519_v41 }
 0x18f   : > { %v1199_v51 = vclamps-f32 %v526_v45, 3.0 }
 0x191   : > { %v574_v1 = vmul.f32 %v1199_v51, %v572_v46  ;;  %v633_v29 = vmul.f32 %v1199_v51, %v631_v14 }
 0x193   : > { %v580_v15 = vrot.slane %v574_v1, 1  ;;  %v605_v1 = vstv %s874_s11 }
 0x19c   : > { %v450_v42 = vpop.permute.xlu1 %449 }
 0x19d   : > { %v448_v43 = vpop.permute.xlu0 %447  ;;  %v454_v20 = vadd.f32 %v450_v42, %v356_v47 }
 0x19e   : > { %v453_v44 = vadd.f32 %v448_v43, %v1151_v52  ;;  %v512_v52 = vadd.f32 %v1105_v48, %v1162_v60 }
 0x19f   : > { %v466_v33 = vadd.f32 %v462_v38, %v454_v20  ;;  %v639_v38 = vrot.slane %v633_v29, 1  ;;  %v690_v20 = vstv %s880_s8 }
 0x1a0   : > { %v465_v49 = vadd.f32 %v460_v35, %v453_v44  ;;  %v692_v2 = vmul.f32 %v1199_v51, %v690_v20 }
 0x1a2   : > { %v479_v32 = vadd.f32 %v474_v4, %v465_v49 }
 0x1a4   : > { %v492_v47 = vadd.f32 %v1160_v58, %v479_v32  ;;  %v517_v54 = vpop.permute.xlu1 %516  ;;  %v515_v58 = vmul.f32 0.5, %v512_v52  ;;  %v545_v52 = vstv %s544_s9 }
 0x1a5   : > { %v476_v55 = vpop.permute.xlu0 %475  ;;  %v525_v56 = vsub.f32 %v513_v50, %v517_v54  ;;  %v865_v54 = vclamps-f32 %v1186_v19, 3.0  ;;  %v272_v19 = vadd.f32 %v1188_v39, %v1128_v12 }
 0x1a6   : > { %v480_v57 = vadd.f32 %v476_v55, %v466_v33  ;;  %v867_v59 = vclamps-f32 %v492_v47, 3.0  ;;  %v698_v33 = vrot.slane %v692_v2, 1 }
 0x1a7   : > { %v869_v3 = vclamps-f32 %v525_v56, 3.0  ;;  %v547_v55 = vmul.f32 %v865_v54, %v545_v52 }
 0x1a8   : > { %v493_v6 = vadd.f32 %v489_v11, %v480_v57  ;;  %v551_v8 = vmul.f32 %v867_v59, %v550_v53  ;;  %v611_v9 = vmul.f32 %v867_v59, %v610_v61  ;;  %v670_v10 = vmul.f32 %v867_v59, %v669_v0 }
 0x1a9   : > { %v573_v7 = vmul.f32 %v869_v3, %v572_v46  ;;  %v632_v60 = vmul.f32 %v869_v3, %v631_v14  ;;  %v691_v44 = vmul.f32 %v869_v3, %v690_v20  ;;  %v597_v59 = vstv %s596_s10 }
 0x1aa   : > { %v868_v13 = vclamps-f32 %v493_v6, 3.0  ;;  %v556_v24 = vrot.slane %v551_v8, 7  ;;  %v615_v25 = vrot.slane %v611_v9, 7  ;;  %v674_v11 = vrot.slane %v670_v10, 7 }
 0x1ab   : > { %v579_v48 = vrot.slane %v573_v7, 1  ;;  %v638_v62 = vrot.slane %v632_v60, 1  ;;  %v697_v45 = vrot.slane %v691_v44, 1  ;;  %v607_v6 = vmul.f32 %v865_v54, %v605_v1 }
 0x1ac   : > { %v552_v16 = vmul.f32 %v868_v13, %v550_v53  ;;  %v612_v21 = vmul.f32 %v868_v13, %v610_v61  ;;  %v671_v5 = vmul.f32 %v868_v13, %v669_v0  ;;  %v656_v13 = vstv %s877_s14 }
 0x1ad   : > { %v521_v22 = vpop.permute.xlu0 %520  ;;  %v581_v23 = vsel %vm255_vm0, %v579_v48, %v580_v15  ;;  %v640_v40 = vsel %vm255_vm0, %v638_v62, %v639_v38  ;;  %v699_v49 = vsel %vm255_vm0, %v697_v45, %v698_v33  ;;  %v287_v48 = vadd.f32 %v280_v18, %v272_v19 }
 0x1ae   : > { %v527_v34 = vsub.f32 %v515_v58, %v521_v22  ;;  %584 = vrot.lane.b32.xlu1 %v581_v23, %s970_s29  ;;  %v557_v26 = vrot.slane %v552_v16, 7  ;;  %v616_v27 = vrot.slane %v612_v21, 7  ;;  %v675_v17 = vrot.slane %v671_v5, 7 }
 0x1af   : > { %v864_v58 = vclamps-f32 %v1179_v28, 3.0 }
 0x1b0   : > { %v871_v30 = vclamps-f32 %v527_v34, 3.0  ;;  %v558_v31 = vsel %vm555_vm4, %v556_v24, %v557_v26  ;;  %v617_v36 = vsel %vm555_vm4, %v615_v25, %v616_v27  ;;  %v676_v37 = vsel %vm555_vm4, %v674_v11, %v675_v17 }
 0x1b1   : > { %v546_v60 = vmul.f32 %v864_v58, %v545_v52 }
 0x1b2   : > { %v575_v35 = vmul.f32 %v871_v30, %v572_v46  ;;  %v634_v41 = vmul.f32 %v871_v30, %v631_v14  ;;  %v693_v32 = vmul.f32 %v871_v30, %v690_v20  ;;  %v715_v30 = vstv %s881_s16 }
 0x1b4   : > { %v582_v4 = vrot.slane %v575_v35, 1  ;;  %v641_v42 = vrot.slane %v634_v41, 1  ;;  %v700_v50 = vrot.slane %v693_v32, 1 }
 0x1b6   : > { %588 = vrot.lane.b32.xlu0 %v582_v4, %s970_s29  ;;  %v583_v63 = vsel %vm255_vm0, %v580_v15, %v582_v4  ;;  %643 = vrot.lane.b32.xlu1 %v640_v40, %s970_s29  ;;  %v642_v43 = vsel %vm255_vm0, %v639_v38, %v641_v42  ;;  %v701_v46 = vsel %vm255_vm0, %v698_v33, %v700_v50 }
 0x1b7   : > { %586 = vrot.lane.b32.xlu2 %v583_v63, %s970_s29 }
 0x1be   : > { %647 = vrot.lane.b32.xlu0 %v641_v42, %s970_s29  ;;  %559 = vrot.lane.b32.xlu1 %v556_v24, %s970_s29  ;;  %v866_v24 = vclamps-f32 %v287_v48, 3.0 }
 0x1bf   : > { %645 = vrot.lane.b32.xlu2 %v642_v43, %s970_s29 }
 0x1c0   : > { %v548_v34 = vmul.f32 %v866_v24, %v545_v52  ;;  %v608_v41 = vmul.f32 %v866_v24, %v605_v1 }
 0x1c6   : > { %563 = vrot.lane.b32.xlu0 %v557_v26, %s970_s29  ;;  %618 = vrot.lane.b32.xlu1 %v615_v25, %s970_s29  ;;  %v664_v25 = vstv %s878_s15  ;;  %v606_v26 = vmul.f32 %v864_v58, %v605_v1 }
 0x1c7   : > { %561 = vrot.lane.b32.xlu2 %v558_v31, %s970_s29  ;;  %v665_v33 = vmul.f32 %v864_v58, %v664_v25  ;;  %v667_v52 = vmul.f32 %v866_v24, %v664_v25 }
 0x1ce   : > { %622 = vrot.lane.b32.xlu0 %v616_v27, %s970_s29  ;;  %677 = vrot.lane.b32.xlu1 %v674_v11, %s970_s29  ;;  %v666_v11 = vmul.f32 %v865_v54, %v664_v25 }
 0x1cf   : > { %620 = vrot.lane.b32.xlu2 %v617_v36, %s970_s29 }
 0x1d6   : > { %681 = vrot.lane.b32.xlu0 %v675_v17, %s970_s29  ;;  %702 = vrot.lane.b32.xlu1 %v699_v49, %s970_s29 }
 0x1d7   : > { %679 = vrot.lane.b32.xlu2 %v676_v37, %s970_s29 }
 0x1de   : > { %706 = vrot.lane.b32.xlu0 %v700_v50, %s970_s29 }
 0x1df   : > { %704 = vrot.lane.b32.xlu2 %v701_v46, %s970_s29 }
 0x211   : > { %v587_v51 = vpop.permute.xlu2 %586 }
 0x219   : > { %v646_v47 = vpop.permute.xlu2 %645 }
 0x220   : > { %v585_v56 = vpop.permute.xlu1 %584 }
 0x221   : > { %v562_v53 = vpop.permute.xlu2 %561 }
 0x222   : > { %v569_v57 = vadd.f32 %v562_v53, %v547_v55 }
 0x224   : > { %v594_v61 = vadd.f32 %v587_v51, %v569_v57 }
 0x226   : > { %v599_v0 = vadd.f32 %v597_v59, %v594_v61 }
 0x228   : > { %v589_v3 = vpop.permute.xlu0 %588  ;;  %v644_v7 = vpop.permute.xlu1 %643  ;;  %v602_v8 = vmax.f32 %v599_v0, 0.0 }
 0x229   : > { %v621_v9 = vpop.permute.xlu2 %620 }
 0x22a   : > { %v628_v10 = vadd.f32 %v621_v9, %v607_v6  ;;  %733 = vrot.lane.b32.xlu2 %v602_v8, %s967_s26 }
 0x22c   : > { %v653_v14 = vadd.f32 %v646_v47, %v628_v10 }
 0x22e   : > { %v658_v15 = vadd.f32 %v656_v13, %v653_v14 }
 0x230   : > { %v648_v16 = vpop.permute.xlu0 %647  ;;  %v560_v21 = vpop.permute.xlu1 %559  ;;  %v661_v5 = vmax.f32 %v658_v15, 0.0 }
 0x231   : > { %v680_v22 = vpop.permute.xlu2 %679  ;;  %v568_v23 = vadd.f32 %v560_v21, %v546_v60 }
 0x232   : > { %739 = vrot.lane.b32.xlu2 %v661_v5, %s967_s26  ;;  %v687_v17 = vadd.f32 %v680_v22, %v666_v11 }
 0x233   : > { %v593_v39 = vadd.f32 %v585_v56, %v568_v23 }
 0x235   : > { %v598_v28 = vadd.f32 %v597_v59, %v593_v39 }
 0x237   : > { %v601_v27 = vmax.f32 %v598_v28, 0.0 }
 0x238   : > { %v564_v12 = vpop.permute.xlu0 %563  ;;  %v619_v18 = vpop.permute.xlu1 %618 }
 0x239   : > { %v570_v29 = vadd.f32 %v564_v12, %v548_v34  ;;  %v705_v31 = vpop.permute.xlu2 %704  ;;  %v627_v36 = vadd.f32 %v619_v18, %v606_v26  ;;  %731 = vrot.lane.b32.xlu1 %v601_v27, %s967_s26 }
 0x23a   : > { %v712_v37 = vadd.f32 %v705_v31, %v687_v17 }
 0x23b   : > { %v595_v62 = vadd.f32 %v589_v3, %v570_v29  ;;  %v652_v35 = vadd.f32 %v644_v7, %v627_v36 }
 0x23c   : > { %v717_v38 = vadd.f32 %v715_v30, %v712_v37 }
 0x23d   : > { %v600_v4 = vadd.f32 %v597_v59, %v595_v62  ;;  %v657_v40 = vadd.f32 %v656_v13, %v652_v35 }
 0x23e   : > { %v720_v63 = vmax.f32 %v717_v38, 0.0 }
 0x23f   : > { %v603_v42 = vmax.f32 %v600_v4, 0.0  ;;  %v660_v43 = vmax.f32 %v657_v40, 0.0 }
 0x240   : > { %v623_v20 = vpop.permute.xlu0 %622  ;;  %745 = vrot.lane.b32.xlu2 %v720_v63, %s967_s26  ;;  %v678_v44 = vpop.permute.xlu1 %677 }
 0x241   : > { %v629_v2 = vadd.f32 %v623_v20, %v608_v41  ;;  %735 = vrot.lane.b32.xlu0 %v603_v42, %s967_s26  ;;  %737 = vrot.lane.b32.xlu1 %v660_v43, %s967_s26  ;;  %v686_v32 = vadd.f32 %v678_v44, %v665_v33 }
 0x243   : > { %v654_v45 = vadd.f32 %v648_v16, %v629_v2 }
 0x245   : > { %v659_v49 = vadd.f32 %v656_v13, %v654_v45 }
 0x247   : > { %v662_v50 = vmax.f32 %v659_v49, 0.0 }
 0x248   : > { %v682_v46 = vpop.permute.xlu0 %681  ;;  %v703_v51 = vpop.permute.xlu1 %702 }
 0x249   : > { %741 = vrot.lane.b32.xlu0 %v662_v50, %s967_s26  ;;  %v711_v47 = vadd.f32 %v703_v51, %v686_v32  ;;  %v688_v56 = vadd.f32 %v682_v46, %v667_v52 }
 0x24b   : > { %v716_v54 = vadd.f32 %v715_v30, %v711_v47 }
 0x24d   : > { %v719_v55 = vmax.f32 %v716_v54, 0.0 }
 0x24f   : > { %743 = vrot.lane.b32.xlu1 %v719_v55, %s967_s26 }
 0x250   : > { %v707_v53 = vpop.permute.xlu0 %706 }
 0x251   : > { %v713_v57 = vadd.f32 %v707_v53, %v688_v56 }
 0x253   : > { %v718_v59 = vadd.f32 %v715_v30, %v713_v57 }
 0x255   : > { %v721_v61 = vmax.f32 %v718_v59, 0.0 }
 0x257   : > { %747 = vrot.lane.b32.xlu0 %v721_v61, %s967_s26 }
 0x284   : > { %v734_v0 = vpop.permute.xlu2 %733 }
 0x285   : > { %761 = vst.msk [vmem:[%s197_s20 + $0x7] sm:$0xff] %vm760_vm5, %v734_v0 }
 0x28c   : > { %v740_v1 = vpop.permute.xlu2 %739 }
 0x28d   : > { %765 = vst.msk [vmem:[%s197_s20 + $0x17] sm:$0xff] %vm760_vm5, %v740_v1 }
 0x29a   : > { %v746_v3 = vpop.permute.xlu2 %745 }
 0x29b   : > { %768 = vst.msk [vmem:[%s197_s20 + $0x27] sm:$0xff] %vm760_vm5, %v746_v3 }
 0x2ab   : > { %v732_v6 = vpop.permute.xlu1 %731 }
 0x2ac   : > { %759 = vst.msk [vmem:[%s197_s20 - $0x1] sm:$0xfe] %vm758_vm6, %v732_v6 }
 0x2b3   : > { %v736_v7 = vpop.permute.xlu0 %735  ;;  %v738_v8 = vpop.permute.xlu1 %737 }
 0x2b4   : > { %763 = vst.msk [vmem:[%s197_s20 + $0xf] sm:$0x1] %vm762_vm7, %v736_v7 }
 0x2b5   : > { %764 = vst.msk [vmem:[%s197_s20 + $0xf] sm:$0xfe] %vm758_vm6, %v738_v8 }
 0x2bb   : > { %v742_v9 = vpop.permute.xlu0 %741 }
 0x2bc   : > { %766 = vst.msk [vmem:[%s197_s20 + $0x1f] sm:$0x1] %vm762_vm7, %v742_v9 }
 0x2c1   : > { %v744_v10 = vpop.permute.xlu1 %743 }
 0x2c2   : > { %767 = vst.msk [vmem:[%s197_s20 + $0x1f] sm:$0xfe] %vm758_vm6, %v744_v10 }
 0x2c9   : > { %v748_v19 = vpop.permute.xlu0 %747 }
 0x2ca   : > { %769 = vst.msk [vmem:[%s197_s20 + $0x2f] sm:$0x1] %vm762_vm7, %v748_v19 }
 0x2cb PF: > { %s15_s12 = sadd.s32 1, %s963_s12  }
 0x2cc   : > { %p12_p7 = scmp.ge.s32.totalorder %s15_s12, 4  }
 0x2ce   :  { %14 = sbr.rel (!%p12_p7) target bundleno = 2 (0x2), region = 73 }
 0x2d3   :  { %791 = vsyncpa [#allocation3], 1 }
 0x2d4   :  { %793 = vsyncpa [#allocation3 + $0x1], 1 }
 0x2d5   :  { %794 = vsyncpa [#allocation5], 1 }

</bundles_post_ra>
